<compile_context>
chip_gen: v7x
topology: tpu7x:2x2x1
jax: 0.10.0
libtpu: 0.0.40
codegen_flags: <defaults>
</compile_context>

<pallas_src>
import functools

import jax
import jax.numpy as jnp
from jax.experimental import pallas as pl
from jax.experimental.pallas import tpu as pltpu


# ---------------------------------------------------------------------------
# Fast path: whole problem VMEM-resident, single fused kernel
#   out = softmax(A @ relu(A @ X @ W1 + b1) @ W2 + b2)
# ---------------------------------------------------------------------------
def _fused_small_kernel(a_ref, x_ref, w1_ref, b1_ref, w2_ref, b2_ref, o_ref,
                        *, num_valid):
    a = a_ref[...]                                                   # [N, N] bf16
    # Layer 1: associate as (A @ X) @ W1 -> N^2 contraction on the narrow side.
    ax = jnp.dot(a, x_ref[...], preferred_element_type=jnp.float32)  # [N, F]
    h = jnp.dot(ax.astype(jnp.bfloat16), w1_ref[...],
                preferred_element_type=jnp.float32)
    h = jnp.maximum(h + b1_ref[...], 0.0)                            # ReLU (f32)
    # TODO(synk): nn.Dropout() is stochastic in train mode; eval-mode identity here.
    g = jnp.dot(h.astype(jnp.bfloat16), w2_ref[...],
                preferred_element_type=jnp.float32)                  # [N, E]
    z = jnp.dot(a, g.astype(jnp.bfloat16),
                preferred_element_type=jnp.float32) + b2_ref[...]
    # Mask lane-padding columns out of the softmax.
    col = jax.lax.broadcasted_iota(jnp.int32, z.shape, 1)
    z = jnp.where(col < num_valid, z, -jnp.inf)
    z = z - jnp.max(z, axis=-1, keepdims=True)
    e = jnp.exp(z)
    denom = jnp.sum(e, axis=-1, keepdims=True)
    o_ref[...] = e * pl.reciprocal(denom, approx=True)


# ---------------------------------------------------------------------------
# Tiled path, stage 1:  G = relu(A_hat @ X @ W1 + b1) @ W2
#   grid = (row tile i, contraction tile k over A_hat columns)
# ---------------------------------------------------------------------------
def _stage1_kernel(a_ref, x_ref, w1_ref, b1_ref, w2_ref, g_ref, acc_ref,
                   *, tk, x_resident):
    k = pl.program_id(1)

    @pl.when(k == 0)
    def _():
        acc_ref[...] = jnp.zeros_like(acc_ref)

    if x_resident:
        # X is VMEM-resident (DMA'd once); slice the contraction tile here.
        start = pl.multiple_of(k * tk, tk)
        x_tile = x_ref[pl.ds(start, tk), :]
    else:
        x_tile = x_ref[...]

    # Accumulate the N^2-wide contraction on the *narrow* side (F_in < H):
    # A_tile [TM, TK] bf16  @  X_tile [TK, F_pad] bf16  -> f32 accumulator.
    acc_ref[...] += jnp.dot(a_ref[...], x_tile,
                            preferred_element_type=jnp.float32)

    @pl.when(k == pl.num_programs(1) - 1)
    def _():
        ax = acc_ref[...].astype(jnp.bfloat16)                       # [TM, F_pad]
        h = jnp.dot(ax, w1_ref[...], preferred_element_type=jnp.float32)
        h = jnp.maximum(h + b1_ref[...], 0.0)                        # ReLU (f32)
        # TODO(synk): nn.Dropout() is stochastic in train mode; eval-mode identity here.
        g = jnp.dot(h.astype(jnp.bfloat16), w2_ref[...],
                    preferred_element_type=jnp.float32)              # [TM, E_pad]
        g_ref[...] = g.astype(g_ref.dtype)


# ---------------------------------------------------------------------------
# Tiled path, stage 2:  out = softmax(A_hat @ G + b2)  (softmax over features)
# ---------------------------------------------------------------------------
def _stage2_kernel(a_ref, g_ref, b2_ref, o_ref, acc_ref,
                   *, tk, g_resident, num_valid):
    k = pl.program_id(1)

    @pl.when(k == 0)
    def _():
        acc_ref[...] = jnp.zeros_like(acc_ref)

    if g_resident:
        start = pl.multiple_of(k * tk, tk)
        g_tile = g_ref[pl.ds(start, tk), :]
    else:
        g_tile = g_ref[...]

    acc_ref[...] += jnp.dot(a_ref[...], g_tile,
                            preferred_element_type=jnp.float32)

    @pl.when(k == pl.num_programs(1) - 1)
    def _():
        z = acc_ref[...] + b2_ref[...]                               # f32
        col = jax.lax.broadcasted_iota(jnp.int32, z.shape, 1)
        z = jnp.where(col < num_valid, z, -jnp.inf)
        z = z - jnp.max(z, axis=-1, keepdims=True)
        e = jnp.exp(z)
        denom = jnp.sum(e, axis=-1, keepdims=True)
        o_ref[...] = e * pl.reciprocal(denom, approx=True)


# ---------------------------------------------------------------------------
# Host-side helpers
# ---------------------------------------------------------------------------
def _round_up(x, m):
    return ((x + m - 1) // m) * m


def _pick_tile(n, candidates, prefer_multi=False):
    divisors = [t for t in candidates if n % t == 0]
    if not divisors:
        return n
    if prefer_multi:
        # Prefer the largest candidate that still leaves >= 2 tiles so the
        # parallel grid axis can shard across v7x's two TensorCores.
        multi = [t for t in divisors if n // t >= 2]
        if multi:
            return multi[0]
    return divisors[0]


def _pad2(x, rows, cols, dtype):
    out = jnp.zeros((rows, cols), dtype)
    return out.at[: x.shape[0], : x.shape[1]].set(x.astype(dtype))


def _vmem_limit_bytes():
    """Scoped VMEM limit with headroom; generation-aware, safe fallback."""
    try:
        cap = int(pltpu.get_tpu_info().vmem_capacity_bytes)
    except Exception:
        cap = 64 * 1024 * 1024  # conservative (v7x physical)
    # Leave headroom for compiler internals / double-buffering bookkeeping.
    return min(int(cap * 3 // 4), 96 * 1024 * 1024)


def _fused_vmem_estimate(n_pad, f_pad, h_pad, e_pad):
    b = n_pad * n_pad * 2                       # A_hat bf16 (resident)
    b += n_pad * f_pad * 2                      # X bf16
    b += f_pad * h_pad * 2 + h_pad * e_pad * 2  # W1, W2 bf16
    b += (h_pad + e_pad) * 4                    # biases f32
    b += n_pad * f_pad * 4                      # A@X f32
    b += n_pad * h_pad * 4                      # H f32
    b += n_pad * e_pad * 4 * 3                  # G / Z / softmax temporaries f32
    b += n_pad * e_pad * 4                      # out f32
    return b


def gcn_forward(a_hat, x, w1, b1, w2, b2, force_tiled=False):
    n, f_in = x.shape
    hid = w1.shape[1]
    enc = w2.shape[1]

    # Pad all lane dims (and the node dim) to multiples of 128 -> lane-dense
    # vregs / unmasked stores, and tiles that satisfy the (8,128) constraint.
    n_pad = _round_up(n, 128)
    f_pad = _round_up(f_in, 128)
    h_pad = _round_up(hid, 128)
    e_pad = _round_up(enc, 128)

    # bf16 MXU inputs (halves HBM/VMEM traffic); f32 accumulation in-kernel.
    a_p = _pad2(a_hat, n_pad, n_pad, jnp.bfloat16)
    x_p = _pad2(x, n_pad, f_pad, jnp.bfloat16)
    w1_p = _pad2(w1, f_pad, h_pad, jnp.bfloat16)
    w2_p = _pad2(w2, h_pad, e_pad, jnp.bfloat16)
    b1_p = _pad2(b1, 1, h_pad, jnp.float32)
    b2_p = _pad2(b2, 1, e_pad, jnp.float32)

    vmem_limit = _vmem_limit_bytes()

    # ------------------------------------------------------------------
    # Fast path: everything (incl. dense A_hat) resident in VMEM -> one
    # fused kernel, A_hat read from HBM exactly once, no G round-trip.
    # ------------------------------------------------------------------
    use_fused = (not force_tiled and
                 _fused_vmem_estimate(n_pad, f_pad, h_pad, e_pad) <= vmem_limit // 2)
    if use_fused:
        out = pl.pallas_call(
            functools.partial(_fused_small_kernel, num_valid=enc),
            out_shape=jax.ShapeDtypeStruct((n_pad, e_pad), jnp.float32),
            compiler_params=pltpu.CompilerParams(vmem_limit_bytes=vmem_limit),
        )(a_p, x_p, w1_p, b1_p, w2_p, b2_p)
        return out[:n, :enc]

    # ------------------------------------------------------------------
    # Tiled path (large graphs): two pallas_calls, each a (row, contraction)
    # grid with an f32 VMEM accumulator and pl.when init/finalize.
    # ------------------------------------------------------------------
    tm = _pick_tile(n_pad, (1024, 512, 256, 128), prefer_multi=True)
    tk = _pick_tile(n_pad, (2048, 1024, 512, 256, 128))

    # Keep X / G VMEM-resident (DMA'd once across the whole grid) unless the
    # full column is too big; fall back to streamed (k,0) tiles otherwise.
    resident_budget = vmem_limit // 6
    x_resident = 2 * (n_pad * f_pad * 2) <= resident_budget
    g_resident = 2 * (n_pad * e_pad * 2) <= resident_budget

    grid = (n_pad // tm, n_pad // tk)
    cparams = pltpu.CompilerParams(
        dimension_semantics=("parallel", "arbitrary"),
        vmem_limit_bytes=vmem_limit,
    )

    if x_resident:
        x_spec = pl.BlockSpec((n_pad, f_pad), lambda i, k: (0, 0))
    else:
        x_spec = pl.BlockSpec((tk, f_pad), lambda i, k: (k, 0))

    # ---- stage 1: G = relu(A@X@W1 + b1) @ W2 ----
    g = pl.pallas_call(
        functools.partial(_stage1_kernel, tk=tk, x_resident=x_resident),
        out_shape=jax.ShapeDtypeStruct((n_pad, e_pad), jnp.bfloat16),
        grid_spec=pltpu.PrefetchScalarGridSpec(
            num_scalar_prefetch=0,
            grid=grid,
            in_specs=[
                pl.BlockSpec((tm, tk), lambda i, k: (i, k)),        # A_hat tile
                x_spec,                                             # X (resident/stream)
                pl.BlockSpec((f_pad, h_pad), lambda i, k: (0, 0)),  # W1
                pl.BlockSpec((1, h_pad), lambda i, k: (0, 0)),      # b1
                pl.BlockSpec((h_pad, e_pad), lambda i, k: (0, 0)),  # W2
            ],
            out_specs=pl.BlockSpec((tm, e_pad), lambda i, k: (i, 0)),
            scratch_shapes=[pltpu.VMEM((tm, f_pad), jnp.float32)],
        ),
        compiler_params=cparams,
    )(a_p, x_p, w1_p, b1_p, w2_p)

    if g_resident:
        g_spec = pl.BlockSpec((n_pad, e_pad), lambda i, k: (0, 0))
    else:
        g_spec = pl.BlockSpec((tk, e_pad), lambda i, k: (k, 0))

    # ---- stage 2: softmax(A@G + b2) ----
    out = pl.pallas_call(
        functools.partial(_stage2_kernel, tk=tk, g_resident=g_resident,
                          num_valid=enc),
        out_shape=jax.ShapeDtypeStruct((n_pad, e_pad), jnp.float32),
        grid_spec=pltpu.PrefetchScalarGridSpec(
            num_scalar_prefetch=0,
            grid=grid,
            in_specs=[
                pl.BlockSpec((tm, tk), lambda i, k: (i, k)),        # A_hat tile
                g_spec,                                             # G (resident/stream)
                pl.BlockSpec((1, e_pad), lambda i, k: (0, 0)),      # b2
            ],
            out_specs=pl.BlockSpec((tm, e_pad), lambda i, k: (i, 0)),
            scratch_shapes=[pltpu.VMEM((tm, e_pad), jnp.float32)],
        ),
        compiler_params=cparams,
    )(a_p, g, b2_p)

    return out[:n, :enc]


def build_normalized_adjacency(edge_index, num_nodes):
    """Dense D^-1/2 (A + I) D^-1/2 from a [2, E] edge_index (glue, plain JAX)."""
    src, dst = edge_index[0], edge_index[1]
    a = jnp.zeros((num_nodes, num_nodes), jnp.float32)
    a = a.at[src, dst].set(1.0)
    a = a.at[dst, src].set(1.0)                                   # undirected
    # self-loops, clamped so pre-existing self-loop edges aren't double counted
    a = jnp.minimum(a + jnp.eye(num_nodes, dtype=jnp.float32), 1.0)
    deg = jnp.sum(a, axis=1)
    d_inv_sqrt = jnp.where(deg > 0, 1.0 / jnp.sqrt(deg), 0.0)
    return a * d_inv_sqrt[:, None] * d_inv_sqrt[None, :]


if __name__ == "__main__":
    # Small, deterministic problem: 16 nodes, input_size=8, hidden_size_1=32, encoding_size=4
    N, INPUT_SIZE, HIDDEN_SIZE_1, ENCODING_SIZE, NUM_EDGES = 16, 8, 32, 4, 32

    key = jax.random.PRNGKey(0)
    k_x, k_e, k_w1, k_b1, k_w2, k_b2 = jax.random.split(key, 6)

    x = jax.random.normal(k_x, (N, INPUT_SIZE), jnp.float32)
    edge_index = jax.random.randint(k_e, (2, NUM_EDGES), 0, N, jnp.int32)

    # Deterministic parameter init (shapes per GCNConvCustom(input_dim, output_dim, with_bias=True))
    w1 = jax.random.normal(k_w1, (INPUT_SIZE, HIDDEN_SIZE_1), jnp.float32) * 0.1
    b1 = jax.random.normal(k_b1, (1, HIDDEN_SIZE_1), jnp.float32) * 0.1
    w2 = jax.random.normal(k_w2, (HIDDEN_SIZE_1, ENCODING_SIZE), jnp.float32) * 0.1
    b2 = jax.random.normal(k_b2, (1, ENCODING_SIZE), jnp.float32) * 0.1

    a_hat = build_normalized_adjacency(edge_index, N)

    # Reference in plain JAX (f32); kernels use bf16 MXU inputs -> loose tolerance.
    h_ref = jnp.maximum(a_hat @ (x @ w1) + b1, 0.0)
    z_ref = a_hat @ (h_ref @ w2) + b2
    ref = jax.nn.softmax(z_ref, axis=-1)

    # Fast (fused, A-resident) path — the one this toy size will use in practice.
    out_fused = jax.block_until_ready(gcn_forward(a_hat, x, w1, b1, w2, b2))
    # Tiled two-stage path — exercised explicitly so both code paths are validated.
    out_tiled = jax.block_until_ready(
        gcn_forward(a_hat, x, w1, b1, w2, b2, force_tiled=True))

    for out in (out_fused, out_tiled):
        assert out.shape == (N, ENCODING_SIZE)
        assert jnp.allclose(jnp.sum(out, axis=-1), 1.0, atol=5e-3)
        assert jnp.allclose(out, ref, atol=2e-2)

    print("KERNEL_OK")
</pallas_src>

<mosaic_0001>
module attributes {stable_mosaic.version = 11 : i64} {
  func.func @_fused_small_kernel(%arg0: memref<128x128xbf16, #tpu.memory_space<vmem>>, %arg1: memref<128x128xbf16, #tpu.memory_space<vmem>>, %arg2: memref<128x128xbf16, #tpu.memory_space<vmem>>, %arg3: memref<1x128xf32, #tpu.memory_space<vmem>>, %arg4: memref<128x128xbf16, #tpu.memory_space<vmem>>, %arg5: memref<1x128xf32, #tpu.memory_space<vmem>>, %arg6: memref<128x128xf32, #tpu.memory_space<vmem>>) attributes {dimension_semantics = [], scalar_prefetch = 0 : i64, scratch_operands = 0 : i64, tpu.core_type = #tpu.core_type<tc>} {
    %c0 = arith.constant 0 : index
    %c0_0 = arith.constant 0 : index
    %0 = vector.load %arg0[%c0, %c0_0] : memref<128x128xbf16, #tpu.memory_space<vmem>>, vector<128x128xbf16>
    %c0_1 = arith.constant 0 : index
    %c0_2 = arith.constant 0 : index
    %1 = vector.load %arg1[%c0_1, %c0_2] : memref<128x128xbf16, #tpu.memory_space<vmem>>, vector<128x128xbf16>
    %cst = arith.constant dense<0.000000e+00> : vector<128x128xf32>
    %2 = tpu.matmul %0, %1, %cst {dimension_numbers = #tpu.dot_dimension_numbers<[1], [0], [0], [1], [0, 0, 1, 1], [], []>} : vector<128x128xbf16>, vector<128x128xbf16>, vector<128x128xf32> -> vector<128x128xf32>
    %3 = arith.truncf %2 : vector<128x128xf32> to vector<128x128xbf16>
    %c0_3 = arith.constant 0 : index
    %c0_4 = arith.constant 0 : index
    %4 = vector.load %arg2[%c0_3, %c0_4] : memref<128x128xbf16, #tpu.memory_space<vmem>>, vector<128x128xbf16>
    %cst_5 = arith.constant dense<0.000000e+00> : vector<128x128xf32>
    %5 = tpu.matmul %3, %4, %cst_5 {dimension_numbers = #tpu.dot_dimension_numbers<[1], [0], [0], [1], [0, 0, 1, 1], [], []>} : vector<128x128xbf16>, vector<128x128xbf16>, vector<128x128xf32> -> vector<128x128xf32>
    %c0_6 = arith.constant 0 : index
    %c0_7 = arith.constant 0 : index
    %6 = vector.load %arg3[%c0_6, %c0_7] : memref<1x128xf32, #tpu.memory_space<vmem>>, vector<1x128xf32>
    %7 = vector.broadcast %6 : vector<1x128xf32> to vector<128x128xf32>
    %8 = arith.addf %5, %7 : vector<128x128xf32>
    %cst_8 = arith.constant 0.000000e+00 : f32
    %9 = vector.broadcast %cst_8 : f32 to vector<128x128xf32>
    %10 = arith.maximumf %8, %9 : vector<128x128xf32>
    %11 = arith.truncf %10 : vector<128x128xf32> to vector<128x128xbf16>
    %c0_9 = arith.constant 0 : index
    %c0_10 = arith.constant 0 : index
    %12 = vector.load %arg4[%c0_9, %c0_10] : memref<128x128xbf16, #tpu.memory_space<vmem>>, vector<128x128xbf16>
    %cst_11 = arith.constant dense<0.000000e+00> : vector<128x128xf32>
    %13 = tpu.matmul %11, %12, %cst_11 {dimension_numbers = #tpu.dot_dimension_numbers<[1], [0], [0], [1], [0, 0, 1, 1], [], []>} : vector<128x128xbf16>, vector<128x128xbf16>, vector<128x128xf32> -> vector<128x128xf32>
    %14 = arith.truncf %13 : vector<128x128xf32> to vector<128x128xbf16>
    %cst_12 = arith.constant dense<0.000000e+00> : vector<128x128xf32>
    %15 = tpu.matmul %0, %14, %cst_12 {dimension_numbers = #tpu.dot_dimension_numbers<[1], [0], [0], [1], [0, 0, 1, 1], [], []>} : vector<128x128xbf16>, vector<128x128xbf16>, vector<128x128xf32> -> vector<128x128xf32>
    %c0_13 = arith.constant 0 : index
    %c0_14 = arith.constant 0 : index
    %16 = vector.load %arg5[%c0_13, %c0_14] : memref<1x128xf32, #tpu.memory_space<vmem>>, vector<1x128xf32>
    %17 = vector.broadcast %16 : vector<1x128xf32> to vector<128x128xf32>
    %18 = arith.addf %15, %17 : vector<128x128xf32>
    %19 = tpu.iota {dimensions = array<i32: 1>} : vector<128x128xi32>
    %c4_i32 = arith.constant 4 : i32
    %20 = vector.broadcast %c4_i32 : i32 to vector<128x128xi32>
    %21 = arith.cmpi slt, %19, %20 : vector<128x128xi32>
    %cst_15 = arith.constant 0xFF800000 : f32
    %22 = vector.broadcast %cst_15 : f32 to vector<128x128xf32>
    %23 = arith.select %21, %18, %22 : vector<128x128xi1>, vector<128x128xf32>
    %cst_16 = arith.constant dense<0xFF800000> : vector<128xf32>
    %24 = vector.multi_reduction <maximumf>, %23, %cst_16 [1] : vector<128x128xf32> to vector<128xf32>
    %25 = vector.shape_cast %24 : vector<128xf32> to vector<128x1xf32>
    %26 = vector.broadcast %25 : vector<128x1xf32> to vector<128x128xf32>
    %27 = arith.subf %23, %26 : vector<128x128xf32>
    %28 = math.exp %27 : vector<128x128xf32>
    %cst_17 = arith.constant dense<0.000000e+00> : vector<128xf32>
    %29 = vector.multi_reduction <add>, %28, %cst_17 [1] : vector<128x128xf32> to vector<128xf32>
    %30 = vector.shape_cast %29 : vector<128xf32> to vector<128x1xf32>
    %31 = tpu.reciprocal %30 {approx = true} : vector<128x1xf32> -> vector<128x1xf32>
    %32 = vector.broadcast %31 : vector<128x1xf32> to vector<128x128xf32>
    %33 = arith.mulf %28, %32 : vector<128x128xf32>
    %c0_18 = arith.constant 0 : index
    %c0_19 = arith.constant 0 : index
    %34 = vector.load %arg6[%c0_18, %c0_19] : memref<128x128xf32, #tpu.memory_space<vmem>>, vector<128x128xf32>
    tpu.vector_store %arg6[%c0_18, %c0_19], %33 {strides = array<i32>} : memref<128x128xf32, #tpu.memory_space<vmem>>, vector<128x128xf32>,
    return
  }
}

</mosaic_0001>

<bundles_post_ra>
// kernel: tpu_custom_call.1
= control target key start
LH: loop header
LB: loop body
LE: loop exit
PB: predicated region body
PF: predicated region fallthrough
CT: control target
= control target key end

     0   :  { %11 = vsyncpa [#allocation3], 0  ;;  %s1736_s0 = inlined_call_operand.hbm [shape: bf16[128,128], index: 0, kind: input, shape index: {}]   ;;  %s1737_s1 = inlined_call_operand.hbm [shape: bf16[128,128], index: 1, kind: input, shape index: {}]   ;;  %s1738_s2 = inlined_call_operand.hbm [shape: bf16[128,128], index: 2, kind: input, shape index: {}]   ;;  %s1739_s3 = inlined_call_operand.vmem [shape: f32[1,128], index: 3, kind: input, shape index: {}]   ;;  %s1740_s4 = inlined_call_operand.hbm [shape: bf16[128,128], index: 4, kind: input, shape index: {}]   ;;  %s1741_s5 = inlined_call_operand.vmem [shape: f32[1,128], index: 5, kind: input, shape index: {}]   ;;  %s1742_s6 = inlined_call_operand.hbm [shape: f32[128,128], index: 6, kind: output, shape index: {}]  }
   0x1   :  { %12 = vsyncpa [#allocation6], 0 }
   0x2   :  { %13 = vsyncpa [#allocation9], 0 }
   0x3   :  { %14 = vsyncpa [#allocation4], 0  ;;  %s1425_s21 = smov [#allocation5]   ;;  %s1426_s23 = smov [#allocation2]  }
   0x4   :  { %s32_s22 = sshll.u32 %s1425_s21, 4  ;;  %s20_s24 = sshll.u32 %s1426_s23, 4  ;;  %s33_s22 = int_to_ptr.vmem [resolvable:$true] %s32_s22  ;;  %s1469_s24 = int_to_ptr.vmem [resolvable:$true] %s20_s24 }
   0x5   :  { %s1307_s27 = scalar_lea.hbm %s1737_s1, 1024 }
   0x6   :  { %p1308_p0 = scmp.ne.s32.totalorder %s1737_s1, %s1307_s27  ;;  %p1311_p1 = scmp.lt.u32.totalorder %s1307_s27, %s1737_s1 }
   0x8   :  { %p1313_p2 = pnand %p1311_p1, %p1308_p0 }
   0xa   :  { %1316 = shalt.err (!%p1313_p2)
}
   0xb   :  { %s1317_s8 = scalar_lea.vmem %s33_s22, 1024  ;;  %p1322_p4 = scmp.lt.s32.totalorder %s33_s22, %s33_s22 }
   0xc   :  { %p1318_p3 = scmp.ne.s32.totalorder %s33_s22, %s1317_s8  ;;  %p1323_p5 = scmp.lt.s32.totalorder %s1317_s8, %s1317_s8 }
   0xe   :  { %p1324_p6 = por %p1323_p5, %p1322_p4 }
  0x10   :  { %p1325_p7 = pnand %p1324_p6, %p1318_p3 }
  0x12   :  { %1328 = shalt.err (!%p1325_p7)
}
  0x13   :  { %s1427_s9 = smov 64   ;;  %s1428_s10 = smov 4  }
  0x14   :  { %38 = dma.hbm_to_vmem [thread:$0]  %s1737_s1, 1024, %s33_s22, [#allocation6], %s1427_s9, %s1427_s9, %s1428_s10  }
  0x15   :  { %s1329_s15 = scalar_lea.hbm %s1736_s0, 1024 }
  0x16   :  { %p1330_p8 = scmp.ne.s32.totalorder %s1736_s0, %s1329_s15  ;;  %p1333_p9 = scmp.lt.u32.totalorder %s1329_s15, %s1736_s0 }
  0x18   :  { %p1335_p10 = pnand %p1333_p9, %p1330_p8 }
  0x1a   :  { %1338 = shalt.err (!%p1335_p10)
}
  0x1b   :  { %s1339_s20 = scalar_lea.vmem %s1469_s24, 1024  ;;  %p1344_p12 = scmp.lt.s32.totalorder %s1469_s24, %s1469_s24 }
  0x1c   :  { %p1340_p11 = scmp.ne.s32.totalorder %s1469_s24, %s1339_s20  ;;  %p1345_p13 = scmp.lt.s32.totalorder %s1339_s20, %s1339_s20 }
  0x1e   :  { %p1346_p0 = por %p1345_p13, %p1344_p12 }
  0x20   :  { %p1347_p1 = pnand %p1346_p0, %p1340_p11 }
  0x22   :  { %1350 = shalt.err (!%p1347_p1)
}
  0x23   :  { %26 = dma.hbm_to_vmem [thread:$0]  %s1736_s0, 1024, %s1469_s24, [#allocation3], %s1427_s9, %s1427_s9, %s1428_s10  }
  0x24   :  { %s1429_s22 = smov [#allocation7]   ;;  %s1430_s25 = smov [#allocation8]  }
  0x25   :  { %s44_s23 = sshll.u32 %s1429_s22, 4  ;;  %s58_s26 = sshll.u32 %s1430_s25, 4  ;;  %s45_s23 = int_to_ptr.vmem [resolvable:$true] %s44_s23  ;;  %s1506_s26 = int_to_ptr.vmem [resolvable:$true] %s58_s26 }
  0x26   :  { %s1351_s29 = scalar_lea.hbm %s1738_s2, 1024 }
  0x27   :  { %p1352_p2 = scmp.ne.s32.totalorder %s1738_s2, %s1351_s29  ;;  %p1355_p3 = scmp.lt.u32.totalorder %s1351_s29, %s1738_s2 }
  0x29   :  { %p1357_p4 = pnand %p1355_p3, %p1352_p2 }
  0x2b   :  { %1360 = shalt.err (!%p1357_p4)
}
  0x2c   :  { %s1361_s0 = scalar_lea.vmem %s45_s23, 1024  ;;  %p1366_p6 = scmp.lt.s32.totalorder %s45_s23, %s45_s23 }
  0x2d   :  { %p1362_p5 = scmp.ne.s32.totalorder %s45_s23, %s1361_s0  ;;  %p1367_p7 = scmp.lt.s32.totalorder %s1361_s0, %s1361_s0 }
  0x2f   :  { %p1368_p8 = por %p1367_p7, %p1366_p6 }
  0x31   :  { %p1369_p9 = pnand %p1368_p8, %p1362_p5 }
  0x33   :  { %1372 = shalt.err (!%p1369_p9)
}
  0x34   :  { %50 = dma.hbm_to_vmem [thread:$0]  %s1738_s2, 1024, %s45_s23, [#allocation6], %s1427_s9, %s1427_s9, %s1428_s10  }
  0x35   :  { %s1373_s15 = scalar_lea.hbm %s1740_s4, 1024 }
  0x36   :  { %p1374_p10 = scmp.ne.s32.totalorder %s1740_s4, %s1373_s15  ;;  %p1377_p11 = scmp.lt.u32.totalorder %s1373_s15, %s1740_s4 }
  0x38   :  { %p1379_p12 = pnand %p1377_p11, %p1374_p10 }
  0x3a   :  { %1382 = shalt.err (!%p1379_p12)
}
  0x3b   :  { %s1383_s20 = scalar_lea.vmem %s1506_s26, 1024  ;;  %p1388_p0 = scmp.lt.s32.totalorder %s1506_s26, %s1506_s26 }
  0x3c   :  { %p1384_p13 = scmp.ne.s32.totalorder %s1506_s26, %s1383_s20  ;;  %p1389_p1 = scmp.lt.s32.totalorder %s1383_s20, %s1383_s20 }
  0x3e   :  { %p1390_p2 = por %p1389_p1, %p1388_p0 }
  0x40   :  { %p1391_p3 = pnand %p1390_p2, %p1384_p13 }
  0x42   :  { %1394 = shalt.err (!%p1391_p3)
}
  0x43   :  { %64 = dma.hbm_to_vmem [thread:$0]  %s1740_s4, 1024, %s1506_s26, [#allocation9], %s1427_s9, %s1427_s9, %s1428_s10  }
  0x44   :  { %1417 = dma.done.wait [#allocation3], 1024  }
  0x45   :  { %1418 = vsyncadd [#allocation3], 4294966272 }
  0x46   :  { %1419 = dma.done.wait [#allocation6], 2048  }
  0x47   :  { %1420 = vsyncadd [#allocation6], 4294965248 }
  0x48   :  { %1421 = dma.done.wait [#allocation9], 1024  }
  0x49   :  { %1422 = vsyncadd [#allocation9], 4294966272  ;;  %v1211_v0 = vld [vmem:[#allocation5] sm:$0xff]   ;;  %v1212_v1 = vld [vmem:[#allocation5 + $0x8] sm:$0xff]  }
  0x4a   :  { %1074 = vmatprep.subr.bf16.mxu0 %v1211_v0  ;;  %v1213_v2 = vld [vmem:[#allocation5 + $0x10] sm:$0xff]   ;;  %v1214_v3 = vld [vmem:[#allocation5 + $0x18] sm:$0xff]   ;;  %v1543_v4 = vld [vmem:[#allocation2] sm:$0xff]  }
  0x4b   :  { %1075 = vmatpush3.bf16.msra.mxu0 %v1211_v0  ;;  %1090 = vmatprep.mubr.bf16.mxu0 %v1543_v4  ;;  %v1215_v5 = vld [vmem:[#allocation5 + $0x20] sm:$0xff]   ;;  %v1216_v6 = vld [vmem:[#allocation5 + $0x28] sm:$0xff]   ;;  %v1217_v9 = vld [vmem:[#allocation5 + $0x30] sm:$0xff]  }
  0x4c   :  { %1076 = vmatprep.subr.bf16.mxu0 %v1212_v1  ;;  %v1227_v7 = vld [vmem:[#allocation7] sm:$0xff]   ;;  %v1228_v8 = vld [vmem:[#allocation7 + $0x8] sm:$0xff]   ;;  %v1229_v10 = vld [vmem:[#allocation7 + $0x10] sm:$0xff]  }
  0x4d   :  { %1106 = vmatprep.subr.bf16.mxu1 %v1227_v7  ;;  %v1218_v11 = vld [vmem:[#allocation5 + $0x38] sm:$0xff]   ;;  %v1231_v13 = vld [vmem:[#allocation7 + $0x20] sm:$0xff]   ;;  %v1546_v14 = vld [vmem:[#allocation2 + $0x8] sm:$0xff]  }
  0x4e   :  { %1107 = vmatpush3.bf16.msra.mxu1 %v1227_v7  ;;  %v1230_v12 = vld [vmem:[#allocation7 + $0x18] sm:$0xff]   ;;  %v1548_v15 = vld [vmem:[#allocation2 + $0x10] sm:$0xff]   ;;  %v1232_v16 = vld [vmem:[#allocation7 + $0x28] sm:$0xff]  }
  0x4f   :  { %1077 = vmatpush3.bf16.msra.mxu0 %v1212_v1  ;;  %1108 = vmatprep.subr.bf16.mxu1 %v1228_v8  ;;  %v1233_v17 = vld [vmem:[#allocation7 + $0x30] sm:$0xff]   ;;  %v1552_v18 = vld [vmem:[#allocation2 + $0x18] sm:$0xff]   ;;  %v1554_v19 = vld [vmem:[#allocation2 + $0x20] sm:$0xff]  }
  0x50   :  { %1078 = vmatprep.subr.bf16.mxu0 %v1213_v2  ;;  %v1558_v20 = vld [vmem:[#allocation2 + $0x28] sm:$0xff]   ;;  %v1560_v21 = vld [vmem:[#allocation2 + $0x30] sm:$0xff]   ;;  %v1564_v22 = vld [vmem:[#allocation2 + $0x38] sm:$0xff]  }
  0x51   :  { %v1234_v23 = vld [vmem:[#allocation7 + $0x38] sm:$0xff]   ;;  %v1235_v24 = vld [vmem:[#allocation8] sm:$0xff]   ;;  %v1236_v25 = vld [vmem:[#allocation8 + $0x8] sm:$0xff]  }
  0x52   :  { %1109 = vmatpush3.bf16.msra.mxu1 %v1228_v8  ;;  %v1237_v26 = vld [vmem:[#allocation8 + $0x10] sm:$0xff]   ;;  %v1238_v27 = vld [vmem:[#allocation8 + $0x18] sm:$0xff]   ;;  %v1239_v28 = vld [vmem:[#allocation8 + $0x20] sm:$0xff]  }
  0x53   :  { %1079 = vmatpush3.bf16.msra.mxu0 %v1213_v2  ;;  %1110 = vmatprep.subr.bf16.mxu1 %v1229_v10  ;;  %v1240_v29 = vld [vmem:[#allocation8 + $0x28] sm:$0xff]   ;;  %v1241_v54 = vld [vmem:[#allocation8 + $0x30] sm:$0xff]   ;;  %v1242_v55 = vld [vmem:[#allocation8 + $0x38] sm:$0xff]  }
  0x54   :  { %1080 = vmatprep.subr.bf16.mxu0 %v1214_v3  ;;  %v992_v56 = vld [vmem:[%s1739_s3] ss:$0 sm:$0xff] }
  0x56   :  { %1111 = vmatpush3.bf16.msra.mxu1 %v1229_v10 }
  0x57   :  { %1081 = vmatpush3.bf16.msra.mxu0 %v1214_v3  ;;  %1112 = vmatprep.subr.bf16.mxu1 %v1230_v12 }
  0x58   :  { %1082 = vmatprep.subr.bf16.mxu0 %v1215_v5 }
  0x5a   :  { %1113 = vmatpush3.bf16.msra.mxu1 %v1230_v12 }
  0x5b   :  { %1083 = vmatpush3.bf16.msra.mxu0 %v1215_v5  ;;  %1114 = vmatprep.subr.bf16.mxu1 %v1231_v13 }
  0x5c   :  { %1084 = vmatprep.subr.bf16.mxu0 %v1216_v6 }
  0x5e   :  { %1115 = vmatpush3.bf16.msra.mxu1 %v1231_v13 }
  0x5f   :  { %1085 = vmatpush3.bf16.msra.mxu0 %v1216_v6  ;;  %1116 = vmatprep.subr.bf16.mxu1 %v1232_v16 }
  0x60   :  { %1086 = vmatprep.subr.bf16.mxu0 %v1217_v9 }
  0x62   :  { %1117 = vmatpush3.bf16.msra.mxu1 %v1232_v16 }
  0x63   :  { %1087 = vmatpush3.bf16.msra.mxu0 %v1217_v9  ;;  %1118 = vmatprep.subr.bf16.mxu1 %v1233_v17 }
  0x64   :  { %1088 = vmatprep.subr.bf16.mxu0 %v1218_v11 }
  0x66   :  { %1119 = vmatpush3.bf16.msra.mxu1 %v1233_v17 }
  0x67   :  { %1089 = vmatpush3.bf16.msra.mxu0 %v1218_v11  ;;  %1120 = vmatprep.subr.bf16.mxu1 %v1234_v23 }
  0x68   :  { %1138 = vmatprep.subr.bf16.mxu0 %v1235_v24 }
  0x6a   :  { %1091 = vmatmul.mubr.bf16.vlgmr.msra.gmra.mrb[0].mxu0 %v1546_v14  ;;  %1121 = vmatpush3.bf16.msra.mxu1 %v1234_v23 }
  0x6b   :  { %1094 = vmatprep.mubr.bf16.mxu0 %v1548_v15  ;;  %1139 = vmatpush3.bf16.msra.mxu0 %v1235_v24 }
  0x6c   :  { %1140 = vmatprep.subr.bf16.mxu0 %v1236_v25 }
  0x6f   :  { %1141 = vmatpush3.bf16.msra.mxu0 %v1236_v25 }
  0x70   :  { %1142 = vmatprep.subr.bf16.mxu0 %v1237_v26 }
  0x72   :  { %1095 = vmatmul.mubr.bf16.gmra.mrb[4].mxu0 %v1552_v18 }
  0x73   :  { %1098 = vmatprep.mubr.bf16.mxu0 %v1554_v19  ;;  %1143 = vmatpush3.bf16.msra.mxu0 %v1237_v26 }
  0x74   :  { %1144 = vmatprep.subr.bf16.mxu0 %v1238_v27 }
  0x77   :  { %1145 = vmatpush3.bf16.msra.mxu0 %v1238_v27 }
  0x78   :  { %1146 = vmatprep.subr.bf16.mxu0 %v1239_v28 }
  0x7a   :  { %1099 = vmatmul.mubr.bf16.gmra.mrb[8].mxu0 %v1558_v20 }
  0x7b   :  { %1102 = vmatprep.mubr.bf16.mxu0 %v1560_v21  ;;  %1147 = vmatpush3.bf16.msra.mxu0 %v1239_v28 }
  0x7c   :  { %1148 = vmatprep.subr.bf16.mxu0 %v1240_v29 }
  0x7f   :  { %1149 = vmatpush3.bf16.msra.mxu0 %v1240_v29 }
  0x80   :  { %1150 = vmatprep.subr.bf16.mxu0 %v1241_v54 }
  0x82   :  { %1103 = vmatmul.mubr.bf16.gmra.mrb[12].mxu0 %v1564_v22 }
  0x83   :  { %1151 = vmatpush3.bf16.msra.mxu0 %v1241_v54 }
  0x84   :  { %1152 = vmatprep.subr.bf16.mxu0 %v1242_v55 }
  0x87   :  { %1153 = vmatpush3.bf16.msra.mxu0 %v1242_v55 }
 0x13d   :  { %v1092_v30 = vpop.f32.mrb[0].mxu0 }
 0x13e   :  { %v242_v31 = vpop.f32.mrb[1].mxu0 }
 0x13f   :  { %v1093_v32 = vpop.f32.mrb[2].mxu0 }
 0x140   :  { %v306_v33 = vpack.c.bf16 %v1093_v32, %v1092_v30  ;;  %v245_v34 = vpop.f32.mrb[3].mxu0 }
 0x141   :  { %v305_v35 = vpack.c.bf16 %v245_v34, %v242_v31 }
 0x143   :  { %1122 = vmatprep.mubr.bf16.mxu1 %v305_v35 }
 0x144   :  { %1123 = vmatmul.mubr.bf16.vlgmr.msra.gmra.mrb[0].mxu1 %v306_v33 }
 0x145   :  { %v1096_v36 = vpop.f32.mrb[4].mxu0 }
 0x146   :  { %v258_v37 = vpop.f32.mrb[5].mxu0 }
 0x147   :  { %v1097_v38 = vpop.f32.mrb[6].mxu0 }
 0x148   :  { %v308_v39 = vpack.c.bf16 %v1097_v38, %v1096_v36  ;;  %v261_v40 = vpop.f32.mrb[7].mxu0 }
 0x149   :  { %v307_v41 = vpack.c.bf16 %v261_v40, %v258_v37 }
 0x14b   :  { %1126 = vmatprep.mubr.bf16.mxu1 %v307_v41 }
 0x14c   :  { %1127 = vmatmul.mubr.bf16.gmra.mrb[4].mxu1 %v308_v39 }
 0x14d   :  { %v1100_v42 = vpop.f32.mrb[8].mxu0 }
 0x14e   :  { %v274_v43 = vpop.f32.mrb[9].mxu0 }
 0x14f   :  { %v1101_v44 = vpop.f32.mrb[10].mxu0 }
 0x150   :  { %v310_v45 = vpack.c.bf16 %v1101_v44, %v1100_v42  ;;  %v277_v46 = vpop.f32.mrb[11].mxu0 }
 0x151   :  { %v309_v47 = vpack.c.bf16 %v277_v46, %v274_v43 }
 0x153   :  { %1130 = vmatprep.mubr.bf16.mxu1 %v309_v47 }
 0x154   :  { %1131 = vmatmul.mubr.bf16.gmra.mrb[8].mxu1 %v310_v45 }
 0x155   :  { %v1104_v48 = vpop.f32.mrb[12].mxu0 }
 0x156   :  { %v290_v49 = vpop.f32.mrb[13].mxu0 }
 0x157   :  { %v1105_v50 = vpop.f32.mrb[14].mxu0 }
 0x158   :  { %v312_v51 = vpack.c.bf16 %v1105_v50, %v1104_v48  ;;  %v293_v52 = vpop.f32.mrb[15].mxu0 }
 0x159   :  { %v311_v53 = vpack.c.bf16 %v293_v52, %v290_v49 }
 0x15b   :  { %1134 = vmatprep.mubr.bf16.mxu1 %v311_v53 }
 0x15c   :  { %1135 = vmatmul.mubr.bf16.gmra.mrb[12].mxu1 %v312_v51 }
 0x15d   :  { %1186 = vmatprep.mubr.bf16.mxu1 %v1543_v4 }
 0x217   :  { %v1124_v57 = vpop.f32.mrb[0].mxu1 }
 0x218   :  { %v427_v58 = vadd.f32 %v1124_v57, %v992_v56  ;;  %v418_v59 = vpop.f32.mrb[1].mxu1 }
 0x219   :  { %v419_v60 = vadd.f32 %v992_v56, %v418_v59  ;;  %v1125_v61 = vpop.f32.mrb[2].mxu1 }
 0x21a   :  { %v430_v62 = vadd.f32 %v1125_v61, %v992_v56  ;;  %v421_v63 = vpop.f32.mrb[3].mxu1  ;;  %v483_v1 = vmax.f32 %v427_v58, 0.0 }
 0x21b   :  { %v422_v0 = vadd.f32 %v992_v56, %v421_v63  ;;  %v481_v3 = vmax.f32 %v419_v60, 0.0 }
 0x21c   :  { %v484_v2 = vmax.f32 %v430_v62, 0.0 }
 0x21d   :  { %v482_v4 = vmax.f32 %v422_v0, 0.0 }
 0x21e   :  { %v498_v5 = vpack.c.bf16 %v484_v2, %v483_v1 }
 0x21f   :  { %v497_v6 = vpack.c.bf16 %v482_v4, %v481_v3  ;;  %v1128_v7 = vpop.f32.mrb[4].mxu1 }
 0x220   :  { %v443_v8 = vadd.f32 %v1128_v7, %v992_v56  ;;  %v434_v9 = vpop.f32.mrb[5].mxu1 }
 0x221   :  { %v435_v10 = vadd.f32 %v992_v56, %v434_v9  ;;  %v1129_v11 = vpop.f32.mrb[6].mxu1  ;;  %1154 = vmatprep.mubr.bf16.mxu0 %v497_v6 }
 0x222   :  { %v446_v12 = vadd.f32 %v1129_v11, %v992_v56  ;;  %v437_v13 = vpop.f32.mrb[7].mxu1  ;;  %1155 = vmatmul.mubr.bf16.vlgmr.msra.gmra.mrb[16].mxu0 %v498_v5  ;;  %v487_v17 = vmax.f32 %v443_v8, 0.0 }
 0x223   :  { %v438_v16 = vadd.f32 %v992_v56, %v437_v13  ;;  %v485_v24 = vmax.f32 %v435_v10, 0.0 }
 0x224   :  { %v488_v23 = vmax.f32 %v446_v12, 0.0 }
 0x225   :  { %v486_v25 = vmax.f32 %v438_v16, 0.0 }
 0x226   :  { %v500_v26 = vpack.c.bf16 %v488_v23, %v487_v17  ;;  %v778_v23 = vlaneseq }
 0x227   :  { %v499_v27 = vpack.c.bf16 %v486_v25, %v485_v24  ;;  %v1132_v28 = vpop.f32.mrb[8].mxu1  ;;  %v1009_v25 = vld [vmem:[%s1741_s5] ss:$0 sm:$0xff]  ;;  %s1431_s5 = smov [#allocation10]  }
 0x228   :  { %v459_v29 = vadd.f32 %v1132_v28, %v992_v56  ;;  %v450_v30 = vpop.f32.mrb[9].mxu1  ;;  %v1578_v24 = vand.u32 127, %v778_v23  ;;  %s962_s21 = sshll.u32 %s1431_s5, 4  ;;  %s963_s21 = int_to_ptr.vmem [resolvable:$true] %s962_s21 }
 0x229   :  { %v451_v31 = vadd.f32 %v992_v56, %v450_v30  ;;  %v1133_v32 = vpop.f32.mrb[10].mxu1  ;;  %1158 = vmatprep.mubr.bf16.mxu0 %v499_v27  ;;  %s1395_s22 = scalar_lea.vmem %s963_s21, 2048  ;;  %p1400_p5 = scmp.lt.s32.totalorder %s963_s21, %s963_s21 }
 0x22a   :  { %v462_v33 = vadd.f32 %v1133_v32, %v992_v56  ;;  %v453_v34 = vpop.f32.mrb[11].mxu1  ;;  %1159 = vmatmul.mubr.bf16.gmra.mrb[20].mxu0 %v500_v26  ;;  %v491_v36 = vmax.f32 %v459_v29, 0.0  ;;  %vm780_vm0 = vcmp.lt.s32.totalorder %v1578_v24, 4  ;;  %p1396_p4 = scmp.ne.s32.totalorder %s963_s21, %s1395_s22  ;;  %p1401_p6 = scmp.lt.s32.totalorder %s1395_s22, %s1395_s22 }
 0x22b   :  { %v454_v35 = vadd.f32 %v992_v56, %v453_v34  ;;  %v489_v38 = vmax.f32 %v451_v31, 0.0 }
 0x22c   :  { %v492_v37 = vmax.f32 %v462_v33, 0.0  ;;  %p1402_p7 = por %p1401_p6, %p1400_p5 }
 0x22d   :  { %v490_v39 = vmax.f32 %v454_v35, 0.0 }
 0x22e   :  { %v502_v40 = vpack.c.bf16 %v492_v37, %v491_v36  ;;  %p1403_p8 = pnand %p1402_p7, %p1396_p4 }
 0x22f   :  { %v501_v41 = vpack.c.bf16 %v490_v39, %v489_v38  ;;  %v1136_v42 = vpop.f32.mrb[12].mxu1 }
 0x230   :  { %v475_v43 = vadd.f32 %v1136_v42, %v992_v56  ;;  %v466_v44 = vpop.f32.mrb[13].mxu1 }
 0x231   :  { %v467_v45 = vadd.f32 %v992_v56, %v466_v44  ;;  %v1137_v46 = vpop.f32.mrb[14].mxu1  ;;  %1162 = vmatprep.mubr.bf16.mxu0 %v501_v41 }
 0x232   :  { %v478_v47 = vadd.f32 %v1137_v46, %v992_v56  ;;  %v469_v48 = vpop.f32.mrb[15].mxu1  ;;  %1163 = vmatmul.mubr.bf16.gmra.mrb[24].mxu0 %v502_v40  ;;  %v495_v50 = vmax.f32 %v475_v43, 0.0 }
 0x233   :  { %v470_v49 = vadd.f32 %v992_v56, %v469_v48  ;;  %v493_v52 = vmax.f32 %v467_v45, 0.0 }
 0x234   :  { %v496_v51 = vmax.f32 %v478_v47, 0.0 }
 0x235   :  { %v494_v53 = vmax.f32 %v470_v49, 0.0 }
 0x236   :  { %v504_v54 = vpack.c.bf16 %v496_v51, %v495_v50 }
 0x237   :  { %v503_v55 = vpack.c.bf16 %v494_v53, %v493_v52 }
 0x239   :  { %1166 = vmatprep.mubr.bf16.mxu0 %v503_v55 }
 0x23a   :  { %1167 = vmatmul.mubr.bf16.gmra.mrb[28].mxu0 %v504_v54 }
 0x2f5   :  { %v1156_v57 = vpop.f32.mrb[16].mxu0 }
 0x2f6   :  { %v603_v58 = vpop.f32.mrb[17].mxu0 }
 0x2f7   :  { %v1157_v59 = vpop.f32.mrb[18].mxu0 }
 0x2f8   :  { %v667_v60 = vpack.c.bf16 %v1157_v59, %v1156_v57  ;;  %v606_v61 = vpop.f32.mrb[19].mxu0 }
 0x2f9   :  { %v666_v62 = vpack.c.bf16 %v606_v61, %v603_v58 }
 0x2fb   :  { %1170 = vmatprep.subr.bf16.mxu1 %v666_v62 }
 0x2fc   :  { %1171 = vmatpush3.bf16.msra.mxu1 %v666_v62 }
 0x2fd   :  { %v1160_v63 = vpop.f32.mrb[20].mxu0  ;;  %1172 = vmatprep.subr.bf16.mxu1 %v667_v60 }
 0x2fe   :  { %v619_v0 = vpop.f32.mrb[21].mxu0 }
 0x2ff   :  { %v1161_v56 = vpop.f32.mrb[22].mxu0 }
 0x300   :  { %v669_v1 = vpack.c.bf16 %v1161_v56, %v1160_v63  ;;  %v622_v2 = vpop.f32.mrb[23].mxu0  ;;  %1173 = vmatpush3.bf16.msra.mxu1 %v667_v60 }
 0x301   :  { %v668_v3 = vpack.c.bf16 %v622_v2, %v619_v0 }
 0x303   :  { %1174 = vmatprep.subr.bf16.mxu1 %v668_v3 }
 0x304   :  { %1175 = vmatpush3.bf16.msra.mxu1 %v668_v3 }
 0x305   :  { %v1164_v4 = vpop.f32.mrb[24].mxu0  ;;  %1176 = vmatprep.subr.bf16.mxu1 %v669_v1 }
 0x306   :  { %v635_v5 = vpop.f32.mrb[25].mxu0 }
 0x307   :  { %v1165_v6 = vpop.f32.mrb[26].mxu0 }
 0x308   :  { %v671_v7 = vpack.c.bf16 %v1165_v6, %v1164_v4  ;;  %v638_v8 = vpop.f32.mrb[27].mxu0  ;;  %1177 = vmatpush3.bf16.msra.mxu1 %v669_v1 }
 0x309   :  { %v670_v9 = vpack.c.bf16 %v638_v8, %v635_v5 }
 0x30b   :  { %1178 = vmatprep.subr.bf16.mxu1 %v670_v9 }
 0x30c   :  { %1179 = vmatpush3.bf16.msra.mxu1 %v670_v9 }
 0x30d   :  { %v1168_v10 = vpop.f32.mrb[28].mxu0  ;;  %1180 = vmatprep.subr.bf16.mxu1 %v671_v7 }
 0x30e   :  { %v651_v11 = vpop.f32.mrb[29].mxu0 }
 0x30f   :  { %v1169_v12 = vpop.f32.mrb[30].mxu0 }
 0x310   :  { %v673_v13 = vpack.c.bf16 %v1169_v12, %v1168_v10  ;;  %v654_v16 = vpop.f32.mrb[31].mxu0  ;;  %1181 = vmatpush3.bf16.msra.mxu1 %v671_v7 }
 0x311   :  { %v672_v17 = vpack.c.bf16 %v654_v16, %v651_v11 }
 0x313   :  { %1182 = vmatprep.subr.bf16.mxu1 %v672_v17 }
 0x314   :  { %1183 = vmatpush3.bf16.msra.mxu1 %v672_v17 }
 0x315   :  { %1184 = vmatprep.subr.bf16.mxu1 %v673_v13 }
 0x318   :  { %1185 = vmatpush3.bf16.msra.mxu1 %v673_v13 }
 0x31b   :  { %1187 = vmatmul.mubr.bf16.vlgmr.msra.gmra.mrb[16].mxu1 %v1546_v14 }
 0x31c   :  { %1190 = vmatprep.mubr.bf16.mxu1 %v1548_v15 }
 0x323   :  { %1191 = vmatmul.mubr.bf16.gmra.mrb[20].mxu1 %v1552_v18 }
 0x324   :  { %1194 = vmatprep.mubr.bf16.mxu1 %v1554_v19 }
 0x32b   :  { %1195 = vmatmul.mubr.bf16.gmra.mrb[24].mxu1 %v1558_v20 }
 0x32c   :  { %1198 = vmatprep.mubr.bf16.mxu1 %v1560_v21 }
 0x333   :  { %1199 = vmatmul.mubr.bf16.gmra.mrb[28].mxu1 %v1564_v22 }
 0x3ee   :  { %v1188_v14 = vpop.f32.mrb[16].mxu1 }
 0x3ef   :  { %v724_v15 = vadd.f32 %v1188_v14, %v1009_v25  ;;  %v715_v18 = vpop.f32.mrb[17].mxu1 }
 0x3f0   :  { %v716_v26 = vadd.f32 %v1009_v25, %v715_v18  ;;  %v1189_v19 = vpop.f32.mrb[18].mxu1 }
 0x3f1   :  { %v727_v27 = vadd.f32 %v1189_v19, %v1009_v25  ;;  %v718_v20 = vpop.f32.mrb[19].mxu1  ;;  %v783_v21 = vsel %vm780_vm0, %v724_v15, -inf }
 0x3f2   :  { %v719_v22 = vadd.f32 %v1009_v25, %v718_v20  ;;  %801 = vmax.xlane.f32.xlu1 %v783_v21  ;;  %v781_v28 = vsel %vm780_vm0, %v716_v26, -inf }
 0x3f3   :  { %797 = vmax.xlane.f32.xlu0 %v781_v28  ;;  %v1590_v29 = vsel %vm780_vm0, %v727_v27, -inf }
 0x3f4   :  { %v1595_v31 = vsel %vm780_vm0, %v719_v22, -inf }
 0x3f6   :  { %803 = vmax.xlane.f32.xlu1 %v1590_v29  ;;  %v1192_v30 = vpop.f32.mrb[20].mxu1 }
 0x3f7   :  { %v740_v32 = vadd.f32 %v1192_v30, %v1009_v25  ;;  %v731_v33 = vpop.f32.mrb[21].mxu1  ;;  %799 = vmax.xlane.f32.xlu0 %v1595_v31 }
 0x3f8   :  { %v1193_v34 = vpop.f32.mrb[22].mxu1  ;;  %v732_v38 = vadd.f32 %v1009_v25, %v731_v33 }
 0x3f9   :  { %v743_v35 = vadd.f32 %v1193_v34, %v1009_v25  ;;  %v734_v36 = vpop.f32.mrb[23].mxu1  ;;  %v787_v37 = vsel %vm780_vm0, %v740_v32, -inf }
 0x3fa   :  { %v735_v39 = vadd.f32 %v1009_v25, %v734_v36  ;;  %v1604_v42 = vsel %vm780_vm0, %v732_v38, -inf }
 0x3fb   :  { %809 = vmax.xlane.f32.xlu0 %v787_v37  ;;  %v788_v40 = vsel %vm780_vm0, %v743_v35, -inf }
 0x3fc   :  { %811 = vmax.xlane.f32.xlu1 %v788_v40  ;;  %v786_v45 = vsel %vm780_vm0, %v735_v39, -inf }
 0x3fe   :  { %v1196_v41 = vpop.f32.mrb[24].mxu1 }
 0x3ff   :  { %v756_v43 = vadd.f32 %v1196_v41, %v1009_v25  ;;  %v747_v44 = vpop.f32.mrb[25].mxu1  ;;  %805 = vmax.xlane.f32.xlu0 %v1604_v42 }
 0x400   :  { %v1197_v46 = vpop.f32.mrb[26].mxu1  ;;  %807 = vmax.xlane.f32.xlu1 %v786_v45  ;;  %v748_v50 = vadd.f32 %v1009_v25, %v747_v44 }
 0x401   :  { %v759_v47 = vadd.f32 %v1197_v46, %v1009_v25  ;;  %v750_v48 = vpop.f32.mrb[27].mxu1  ;;  %v1611_v49 = vsel %vm780_vm0, %v756_v43, -inf }
 0x402   :  { %v751_v51 = vadd.f32 %v1009_v25, %v750_v48  ;;  %v1621_v54 = vsel %vm780_vm0, %v748_v50, -inf }
 0x403   :  { %817 = vmax.xlane.f32.xlu0 %v1611_v49  ;;  %v1616_v52 = vsel %vm780_vm0, %v759_v47, -inf }
 0x404   :  { %819 = vmax.xlane.f32.xlu1 %v1616_v52  ;;  %v1626_v57 = vsel %vm780_vm0, %v751_v51, -inf }
 0x406   :  { %v1200_v53 = vpop.f32.mrb[28].mxu1 }
 0x407   :  { %v763_v55 = vpop.f32.mrb[29].mxu1  ;;  %813 = vmax.xlane.f32.xlu0 %v1621_v54  ;;  %v772_v61 = vadd.f32 %v1200_v53, %v1009_v25 }
 0x408   :  { %v764_v58 = vadd.f32 %v1009_v25, %v763_v55  ;;  %v1201_v59 = vpop.f32.mrb[30].mxu1  ;;  %815 = vmax.xlane.f32.xlu1 %v1626_v57 }
 0x409   :  { %v766_v60 = vpop.f32.mrb[31].mxu1  ;;  %v775_v0 = vadd.f32 %v1201_v59, %v1009_v25  ;;  %v1641_v1 = vsel %vm780_vm0, %v772_v61, -inf }
 0x40a   :  { %v767_v62 = vadd.f32 %v1009_v25, %v766_v60  ;;  %v1631_v63 = vsel %vm780_vm0, %v764_v58, -inf }
 0x40b   :  { %821 = vmax.xlane.f32.xlu0 %v1631_v63  ;;  %v1646_v2 = vsel %vm780_vm0, %v775_v0, -inf }
 0x40c   :  { %v1636_v56 = vsel %vm780_vm0, %v767_v62, -inf }
 0x40d   :  { %823 = vmax.xlane.f32.xlu1 %v1636_v56 }
 0x40f   :  { %825 = vmax.xlane.f32.xlu0 %v1641_v1 }
 0x411   :  { %827 = vmax.xlane.f32.xlu1 %v1646_v2 }
 0x47f   :  { %v802_v3 = vpop.xlane.xlu1 %801 }
 0x480   :  { %v831_v4 = vsub.f32 %v783_v21, %v802_v3  ;;  %v798_v5 = vpop.xlane.xlu0 %797 }
 0x481   :  { %v829_v6 = vsub.f32 %v781_v28, %v798_v5 }
 0x482   :  { %v849_v7 = vmul.f32 1.442695, %v831_v4 }
 0x483   :  { %v845_v8 = vmul.f32 1.442695, %v829_v6  ;;  %v804_v9 = vpop.xlane.xlu1 %803 }
 0x484   :  { %1243 = vpow2.f32 %v849_v7  ;;  %v832_v10 = vsub.f32 %v1590_v29, %v804_v9  ;;  %v800_v11 = vpop.xlane.xlu0 %799 }
 0x485   :  { %v830_v12 = vsub.f32 %v1595_v31, %v800_v11  ;;  %1245 = vpow2.f32 %v845_v8 }
 0x486   :  { %v851_v13 = vmul.f32 1.442695, %v832_v10 }
 0x487   :  { %v847_v16 = vmul.f32 1.442695, %v830_v12 }
 0x488   :  { %1247 = vpow2.f32 %v851_v13  ;;  %v810_v17 = vpop.xlane.xlu0 %809 }
 0x489   :  { %v835_v23 = vsub.f32 %v787_v37, %v810_v17  ;;  %v812_v24 = vpop.xlane.xlu1 %811  ;;  %1249 = vpow2.f32 %v847_v16 }
 0x48a   :  { %v836_v25 = vsub.f32 %v788_v40, %v812_v24 }
 0x48b   :  { %v857_v14 = vmul.f32 1.442695, %v835_v23 }
 0x48c   :  { %v859_v15 = vmul.f32 1.442695, %v836_v25  ;;  %v806_v18 = vpop.xlane.xlu0 %805 }
 0x48d   :  { %1251 = vpow2.f32 %v857_v14  ;;  %v833_v26 = vsub.f32 %v1604_v42, %v806_v18  ;;  %v808_v19 = vpop.xlane.xlu1 %807 }
 0x48e   :  { %v1652_v27 = vpop.eup %1243  ;;  %v834_v20 = vsub.f32 %v786_v45, %v808_v19  ;;  %1253 = vpow2.f32 %v859_v15 }
 0x48f   :  { %v853_v21 = vmul.f32 1.442695, %v833_v26  ;;  %881 = vadd.xlane.f32.xlu0 %v1652_v27  ;;  %v1655_v29 = vpop.eup %1245 }
 0x490   :  { %v855_v22 = vmul.f32 1.442695, %v834_v20  ;;  %v818_v28 = vpop.xlane.xlu0 %817 }
 0x491   :  { %1255 = vpow2.f32 %v853_v21  ;;  %v839_v30 = vsub.f32 %v1611_v49, %v818_v28  ;;  %v820_v31 = vpop.xlane.xlu1 %819 }
 0x492   :  { %v1658_v32 = vpop.eup %1247  ;;  %v840_v33 = vsub.f32 %v1616_v52, %v820_v31  ;;  %1257 = vpow2.f32 %v855_v22 }
 0x493   :  { %v865_v34 = vmul.f32 1.442695, %v839_v30  ;;  %883 = vadd.xlane.f32.xlu1 %v1658_v32  ;;  %877 = vadd.xlane.f32.xlu0 %v1655_v29  ;;  %v1664_v39 = vpop.eup %1249 }
 0x494   :  { %v867_v35 = vmul.f32 1.442695, %v840_v33  ;;  %v814_v36 = vpop.xlane.xlu0 %813 }
 0x495   :  { %1259 = vpow2.f32 %v865_v34  ;;  %v837_v37 = vsub.f32 %v1621_v54, %v814_v36  ;;  %v816_v38 = vpop.xlane.xlu1 %815 }
 0x496   :  { %v838_v40 = vsub.f32 %v1626_v57, %v816_v38  ;;  %1261 = vpow2.f32 %v867_v35 }
 0x497   :  { %v1667_v41 = vpop.eup %1251  ;;  %v861_v42 = vmul.f32 1.442695, %v837_v37  ;;  %879 = vadd.xlane.f32.xlu1 %v1664_v39 }
 0x498   :  { %v863_v43 = vmul.f32 1.442695, %v838_v40  ;;  %889 = vadd.xlane.f32.xlu0 %v1667_v41  ;;  %v822_v44 = vpop.xlane.xlu0 %821  ;;  %v1672_v46 = vpop.eup %1253 }
 0x499   :  { %1263 = vpow2.f32 %v861_v42  ;;  %v841_v45 = vsub.f32 %v1631_v63, %v822_v44 }
 0x49a   :  { %v824_v47 = vpop.xlane.xlu1 %823  ;;  %1265 = vpow2.f32 %v863_v43 }
 0x49b   :  { %v1674_v48 = vpop.eup %1255  ;;  %v869_v49 = vmul.f32 1.442695, %v841_v45  ;;  %v842_v50 = vsub.f32 %v1636_v56, %v824_v47  ;;  %891 = vadd.xlane.f32.xlu1 %v1672_v46 }
 0x49c   :  { %885 = vadd.xlane.f32.xlu0 %v1674_v48  ;;  %v826_v51 = vpop.xlane.xlu0 %825  ;;  %v1680_v54 = vpop.eup %1257 }
 0x49d   :  { %1267 = vpow2.f32 %v869_v49  ;;  %v871_v52 = vmul.f32 1.442695, %v842_v50  ;;  %v843_v53 = vsub.f32 %v1641_v1, %v826_v51 }
 0x49e   :  { %v828_v55 = vpop.xlane.xlu1 %827 }
 0x49f   :  { %v1682_v57 = vpop.eup %1259  ;;  %1269 = vpow2.f32 %v871_v52  ;;  %v873_v58 = vmul.f32 1.442695, %v843_v53  ;;  %v844_v59 = vsub.f32 %v1646_v2, %v828_v55  ;;  %887 = vadd.xlane.f32.xlu1 %v1680_v54 }
 0x4a0   :  { %897 = vadd.xlane.f32.xlu0 %v1682_v57  ;;  %v1687_v61 = vpop.eup %1261 }
 0x4a1   :  { %1271 = vpow2.f32 %v873_v58  ;;  %v875_v60 = vmul.f32 1.442695, %v844_v59 }
 0x4a3   :  { %v1689_v62 = vpop.eup %1263  ;;  %1273 = vpow2.f32 %v875_v60  ;;  %899 = vadd.xlane.f32.xlu1 %v1687_v61 }
 0x4a4   :  { %893 = vadd.xlane.f32.xlu0 %v1689_v62  ;;  %v1693_v63 = vpop.eup %1265 }
 0x4a7   :  { %v1695_v0 = vpop.eup %1267  ;;  %895 = vadd.xlane.f32.xlu1 %v1693_v63 }
 0x4a8   :  { %901 = vadd.xlane.f32.xlu0 %v1695_v0 }
 0x4a9   :  { %v1699_v56 = vpop.eup %1269 }
 0x4ab   :  { %v1701_v1 = vpop.eup %1271  ;;  %903 = vadd.xlane.f32.xlu1 %v1699_v56 }
 0x4ac   :  { %905 = vadd.xlane.f32.xlu0 %v1701_v1 }
 0x4ad   :  { %v1705_v2 = vpop.eup %1273 }
 0x4af   :  { %907 = vadd.xlane.f32.xlu1 %v1705_v2 }
 0x51c   :  { %v882_v3 = vpop.xlane.xlu0 %881 }
 0x51d   :  { %1275 = vrcp.f32 %v882_v3 }
 0x520   :  { %v884_v4 = vpop.xlane.xlu1 %883  ;;  %v878_v5 = vpop.xlane.xlu0 %877 }
 0x521   :  { %1277 = vrcp.f32 %v884_v4 }
 0x522   :  { %1279 = vrcp.f32 %v878_v5 }
 0x524   :  { %v880_v6 = vpop.xlane.xlu1 %879 }
 0x525   :  { %1281 = vrcp.f32 %v880_v6  ;;  %v890_v7 = vpop.xlane.xlu0 %889 }
 0x526   :  { %1283 = vrcp.f32 %v890_v7 }
 0x527   :  { %v1276_v8 = vpop.eup %1275 }
 0x528   :  { %v927_v9 = vmul.f32 %v1276_v8, %v1652_v27  ;;  %v892_v10 = vpop.xlane.xlu1 %891 }
 0x529   :  { %1285 = vrcp.f32 %v892_v10  ;;  %v886_v11 = vpop.xlane.xlu0 %885 }
 0x52a   :  { %943 = vst [vmem:[#allocation10 + $0x10] sm:$0xff] %v927_v9  ;;  %1287 = vrcp.f32 %v886_v11 }
 0x52b   :  { %v1278_v12 = vpop.eup %1277 }
 0x52c   :  { %v1280_v13 = vpop.eup %1279  ;;  %v928_v16 = vmul.f32 %v1278_v12, %v1658_v32  ;;  %v888_v17 = vpop.xlane.xlu1 %887 }
 0x52d   :  { %v925_v23 = vmul.f32 %v1280_v13, %v1655_v29  ;;  %1289 = vrcp.f32 %v888_v17  ;;  %v898_v24 = vpop.xlane.xlu0 %897 }
 0x52e   :  { %944 = vst [vmem:[#allocation10 + $0x18] sm:$0xff] %v928_v16  ;;  %1291 = vrcp.f32 %v898_v24 }
 0x52f   :  { %v1282_v25 = vpop.eup %1281  ;;  %941 = vst [vmem:[#allocation10] sm:$0xff] %v925_v23 }
 0x530   :  { %v1284_v14 = vpop.eup %1283  ;;  %v926_v15 = vmul.f32 %v1282_v25, %v1664_v39  ;;  %v900_v18 = vpop.xlane.xlu1 %899 }
 0x531   :  { %v931_v26 = vmul.f32 %v1284_v14, %v1667_v41  ;;  %1293 = vrcp.f32 %v900_v18  ;;  %v894_v19 = vpop.xlane.xlu0 %893 }
 0x532   :  { %942 = vst [vmem:[#allocation10 + $0x8] sm:$0xff] %v926_v15  ;;  %1295 = vrcp.f32 %v894_v19 }
 0x533   :  { %v1286_v27 = vpop.eup %1285  ;;  %947 = vst [vmem:[#allocation10 + $0x30] sm:$0xff] %v931_v26 }
 0x534   :  { %v1288_v20 = vpop.eup %1287  ;;  %v932_v21 = vmul.f32 %v1286_v27, %v1672_v46  ;;  %v896_v22 = vpop.xlane.xlu1 %895 }
 0x535   :  { %v929_v28 = vmul.f32 %v1288_v20, %v1674_v48  ;;  %1297 = vrcp.f32 %v896_v22  ;;  %v902_v29 = vpop.xlane.xlu0 %901 }
 0x536   :  { %948 = vst [vmem:[#allocation10 + $0x38] sm:$0xff] %v932_v21  ;;  %1299 = vrcp.f32 %v902_v29 }
 0x537   :  { %v1290_v30 = vpop.eup %1289  ;;  %945 = vst [vmem:[#allocation10 + $0x20] sm:$0xff] %v929_v28 }
 0x538   :  { %v1292_v31 = vpop.eup %1291  ;;  %v930_v32 = vmul.f32 %v1290_v30, %v1680_v54  ;;  %v904_v33 = vpop.xlane.xlu1 %903 }
 0x539   :  { %v935_v34 = vmul.f32 %v1292_v31, %v1682_v57  ;;  %1301 = vrcp.f32 %v904_v33  ;;  %v906_v35 = vpop.xlane.xlu0 %905 }
 0x53a   :  { %946 = vst [vmem:[#allocation10 + $0x28] sm:$0xff] %v930_v32  ;;  %1303 = vrcp.f32 %v906_v35 }
 0x53b   :  { %v1294_v36 = vpop.eup %1293  ;;  %951 = vst [vmem:[#allocation10 + $0x50] sm:$0xff] %v935_v34 }
 0x53c   :  { %v1296_v37 = vpop.eup %1295  ;;  %v936_v38 = vmul.f32 %v1294_v36, %v1687_v61  ;;  %v908_v39 = vpop.xlane.xlu1 %907 }
 0x53d   :  { %v933_v40 = vmul.f32 %v1296_v37, %v1689_v62  ;;  %1305 = vrcp.f32 %v908_v39 }
 0x53e   :  { %952 = vst [vmem:[#allocation10 + $0x58] sm:$0xff] %v936_v38 }
 0x53f   :  { %v1298_v41 = vpop.eup %1297  ;;  %949 = vst [vmem:[#allocation10 + $0x40] sm:$0xff] %v933_v40 }
 0x540   :  { %v1300_v42 = vpop.eup %1299  ;;  %v934_v43 = vmul.f32 %v1298_v41, %v1693_v63 }
 0x541   :  { %v937_v44 = vmul.f32 %v1300_v42, %v1695_v0 }
 0x542   :  { %950 = vst [vmem:[#allocation10 + $0x48] sm:$0xff] %v934_v43 }
 0x543   :  { %v1302_v45 = vpop.eup %1301  ;;  %953 = vst [vmem:[#allocation10 + $0x60] sm:$0xff] %v937_v44 }
 0x544   :  { %v1304_v46 = vpop.eup %1303  ;;  %v938_v47 = vmul.f32 %v1302_v45, %v1699_v56 }
 0x545   :  { %v939_v48 = vmul.f32 %v1304_v46, %v1701_v1 }
 0x546   :  { %954 = vst [vmem:[#allocation10 + $0x68] sm:$0xff] %v938_v47 }
 0x547   :  { %v1306_v49 = vpop.eup %1305  ;;  %955 = vst [vmem:[#allocation10 + $0x70] sm:$0xff] %v939_v48 }
 0x548   :  { %v940_v50 = vmul.f32 %v1306_v49, %v1705_v2 }
 0x54a   :  { %956 = vst [vmem:[#allocation10 + $0x78] sm:$0xff] %v940_v50 }
 0x54b   :  { %1406 = shalt.err (!%p1403_p8)
}
 0x54c   :  { %s1407_s26 = scalar_lea.hbm %s1742_s6, 2048 }
 0x54d   :  { %p1408_p9 = scmp.ne.s32.totalorder %s1742_s6, %s1407_s26  ;;  %p1411_p10 = scmp.lt.u32.totalorder %s1407_s26, %s1742_s6 }
 0x54f   :  { %p1413_p11 = pnand %p1411_p10, %p1408_p9 }
 0x551   :  { %1416 = shalt.err (!%p1413_p11)
}
 0x552   :  { %s1432_s7 = smov 128   ;;  %s1433_s8 = smov 8  }
 0x553   :  { %968 = dma.vmem_to_hbm [thread:$0]  %s963_s21, 2048, %s1742_s6, [#allocation4], %s1432_s7, %s1432_s7, %s1433_s8  }
 0x554   :  { %1423 = dma.done.wait [#allocation4], 2048  }
 0x555   :  { %1424 = vsyncadd [#allocation4], 4294965248 }
 0x556   :  { %972 = vsyncpa [#allocation3], 1 }
 0x557   :  { %973 = vsyncpa [#allocation6], 1 }
 0x558   :  { %974 = vsyncpa [#allocation9], 1 }
 0x559   :  { %975 = vsyncpa [#allocation4], 1 }

</bundles_post_ra>
